<compile_context>
chip_gen: v5e
topology: v5e:2x2
jax: 0.10.0
libtpu: 0.0.40
codegen_flags: <defaults>
</compile_context>

<pallas_src>
import functools

import jax
import jax.numpy as jnp
from jax.experimental import pallas as pl
from jax.experimental.pallas import tpu as pltpu

# Channel widths along depth_reg's forward pass.
C_IN = 128   # input to reg_convtr6p4s2
C1 = 96      # reg_convtr6p4s2 -> reg_bntr6 -> relu
C2 = 64      # enc_1_remi -> relu
C3 = 64      # reg_convtr7p2s2 -> reg_bntr7 -> relu
C4 = 32      # enc_2_remi -> relu            (also feeds the channel mean)
C5 = 96      # dec_remi (1x1 conv, exact pointwise) -> relu

OUT_W = 128      # packed lane-dense output width
MEAN_COL = C5    # column holding the channel mean (intensity_res)


# ----------------------------- kernel ---------------------------------------


def _depth_reg_kernel(x_ref,
                      w1_ref, b1_ref, w2_ref, b2_ref, w3_ref, b3_ref,
                      w4_ref, b4_ref, w5_ref, b5_ref,
                      out_ref):
    # x and weights arrive as bf16 (native MXU dtype on v5e/v6e/v7x);
    # accumulation is f32 via preferred_element_type, biases are f32.
    def lin_relu(h_bf16, w_ref, b_ref):
        z = jnp.dot(h_bf16, w_ref[...], preferred_element_type=jnp.float32)
        z = z + b_ref[...]
        # cast back to bf16 so the next matmul stays on the native MXU path
        return jnp.maximum(z, 0.0).astype(jnp.bfloat16)

    h = lin_relu(x_ref[...], w1_ref, b1_ref)    # 128 -> 96   convtr6 + bn6 + relu
    h = lin_relu(h, w2_ref, b2_ref)             # 96  -> 64   enc_1_remi + relu
    h = lin_relu(h, w3_ref, b3_ref)             # 64  -> 64   convtr7 + bn7 + relu
    h = lin_relu(h, w4_ref, b4_ref)             # 64  -> 32   enc_2_remi + relu

    # Packed last layer (32 -> 128):
    #   cols 0..95   : dec_remi + bn + relu   (remi2seg)
    #   col  96      : channel mean of h      (intensity_res; 1/32 column in w5)
    #   cols 97..127 : zeros (padding)
    z = jnp.dot(h, w5_ref[...], preferred_element_type=jnp.float32) + b5_ref[...]
    # ReLU applied to all 128 lanes: h >= 0 so its mean (col 96) is already
    # non-negative, and the padding columns are exactly 0 -> identical result
    # to masking the ReLU to cols < 96, without the extra iota/where.
    out_ref[...] = jnp.maximum(z, 0.0).astype(out_ref.dtype)


# ----------------------------- wrapper ---------------------------------------


def _full_spec(shape):
    # whole-array block, same block for every grid step
    return pl.BlockSpec(shape, lambda i, _n=len(shape): (0,) * _n)


def _pick_tile_m(n):
    # Aim for >= 8 grid steps (>= 4 per v7x TensorCore) so the input/output
    # DMAs stay hidden behind compute, while still allowing large tiles
    # (fewer ~0.35us per-step costs) for big point clouds.
    for t in (4096, 2048, 1024, 512, 256):
        if pl.cdiv(n, t) >= 8:
            return t
    return 256


@functools.partial(jax.jit, static_argnames=("tile_m",))
def depth_reg_forward(x, params, *, tile_m=None):
    """Fused depth_reg forward.

    x: (N, 128) point features (f32 or bf16; cast to bf16 internally).
    params: tuple (w1, b1, ..., w5, b5) with BN folded in (f32).
    Returns (intensity_res (N, 1), remi2seg (N, 96)), both f32.
    """
    n, c = x.shape
    assert c == C_IN
    w1, b1, w2, b2, w3, b3, w4, b4, w5, b5 = params

    if tile_m is None:
        tile_m = _pick_tile_m(n)

    # Pack dec_remi weight + the 1/32 mean column + zero padding into a single
    # lane-dense (32, 128) weight so seg and intensity come out of one matmul.
    w5p = jnp.zeros((C4, OUT_W), jnp.float32)
    w5p = w5p.at[:, :C5].set(w5)
    w5p = w5p.at[:, MEAN_COL].set(1.0 / C4)          # exactly representable in bf16
    b5p = jnp.zeros((1, OUT_W), jnp.float32).at[:, :C5].set(b5)

    # bf16 MXU path: inputs + weights bf16, biases stay f32 (added to the f32
    # accumulator inside the kernel).
    x = x.astype(jnp.bfloat16)
    w_bf = [w.astype(jnp.bfloat16) for w in (w1, w2, w3, w4, w5p)]
    b_f32 = [b.astype(jnp.float32) for b in (b1, b2, b3, b4, b5p)]

    # Real point clouds are rarely multiples of the tile: pad rows up to a
    # multiple of tile_m (padded rows are sliced off afterwards).
    n_pad = pl.cdiv(n, tile_m) * tile_m
    if n_pad != n:
        x = jnp.pad(x, ((0, n_pad - n), (0, 0)))
    grid = (n_pad // tile_m,)

    packed = pl.pallas_call(
        _depth_reg_kernel,
        out_shape=jax.ShapeDtypeStruct((n_pad, OUT_W), jnp.float32),
        grid_spec=pltpu.PrefetchScalarGridSpec(
            num_scalar_prefetch=0,
            grid=grid,
            in_specs=[
                pl.BlockSpec((tile_m, C_IN), lambda i: (i, 0)),
                _full_spec((C_IN, C1)), _full_spec((1, C1)),
                _full_spec((C1, C2)), _full_spec((1, C2)),
                _full_spec((C2, C3)), _full_spec((1, C3)),
                _full_spec((C3, C4)), _full_spec((1, C4)),
                _full_spec((C4, OUT_W)), _full_spec((1, OUT_W)),
            ],
            out_specs=pl.BlockSpec((tile_m, OUT_W), lambda i: (i, 0)),
        ),
        compiler_params=pltpu.CompilerParams(
            dimension_semantics=("parallel",),      # megacore / v7x 2-TC sharding
            vmem_limit_bytes=32 * 1024 * 1024,      # ample even at tile_m=4096
        ),
    )(x,
      w_bf[0], b_f32[0], w_bf[1], b_f32[1], w_bf[2], b_f32[2],
      w_bf[3], b_f32[3], w_bf[4], b_f32[4])

    seg = packed[:n, :C5]
    inten = packed[:n, MEAN_COL:MEAN_COL + 1]
    return inten, seg


# --------------------------- param helpers -----------------------------------


def fold_conv_bn(w, gamma, beta, mean, var, eps=1e-5):
    """Fold eval-mode BatchNorm into a pointwise conv weight (Cin, Cout)."""
    scale = gamma / jnp.sqrt(var + eps)
    w_f = w * scale[None, :]
    b_f = (beta - mean * scale)[None, :]   # (1, Cout)
    return w_f, b_f


# ----------------------------- reference -------------------------------------


def depth_reg_reference(x, raw):
    """Pure-JAX f32 reference with explicit (unfolded) eval-mode BatchNorm."""
    def block(h, w, bn, eps=1e-5):
        gamma, beta, mean, var = bn
        z = h @ w
        z = gamma * (z - mean) / jnp.sqrt(var + eps) + beta
        return jnp.maximum(z, 0.0)

    h = block(x, raw["w1"], raw["bn1"])
    h = block(h, raw["w2"], raw["bn2"])
    h = block(h, raw["w3"], raw["bn3"])
    h = block(h, raw["w4"], raw["bn4"])
    inten = jnp.mean(h, axis=-1, keepdims=True)
    seg = block(h, raw["w5"], raw["bn5"])
    return inten, seg


# ------------------------------- main ----------------------------------------

if __name__ == "__main__":
    n_points = 2000            # not a multiple of the tile -> exercises padding

    key = jax.random.PRNGKey(0)
    k_x, k_w, k_bn = jax.random.split(key, 3)
    wkeys = jax.random.split(k_w, 5)
    bnkeys = jax.random.split(k_bn, 5)

    def conv_w(k, cin, cout):
        return jax.random.normal(k, (cin, cout), jnp.float32) / jnp.sqrt(cin)

    def bn_params(k, c):
        k1, k2, k3, k4 = jax.random.split(k, 4)
        gamma = 1.0 + 0.1 * jax.random.normal(k1, (c,), jnp.float32)
        beta = 0.1 * jax.random.normal(k2, (c,), jnp.float32)
        mean = 0.1 * jax.random.normal(k3, (c,), jnp.float32)
        var = 1.0 + 0.1 * jax.random.uniform(k4, (c,), jnp.float32)
        return gamma, beta, mean, var

    dims = [(C_IN, C1), (C1, C2), (C2, C3), (C3, C4), (C4, C5)]
    raw = {}
    for idx, (cin, cout) in enumerate(dims, start=1):
        raw[f"w{idx}"] = conv_w(wkeys[idx - 1], cin, cout)
        raw[f"bn{idx}"] = bn_params(bnkeys[idx - 1], cout)

    folded = []
    for idx in range(1, 6):
        w_f, b_f = fold_conv_bn(raw[f"w{idx}"], *raw[f"bn{idx}"])
        folded.extend([w_f, b_f])
    params = tuple(folded)

    x = jax.random.normal(k_x, (n_points, C_IN), jnp.float32)

    inten, seg = depth_reg_forward(x, params)      # tile_m auto-sized (256 here)
    inten = jax.block_until_ready(inten)
    seg = jax.block_until_ready(seg)

    # correctness check vs pure-JAX f32 reference; tolerance loosened for the
    # bf16 MXU path (per perf-review correctness note).
    ref_inten, ref_seg = depth_reg_reference(x, raw)
    assert inten.shape == (n_points, 1)
    assert seg.shape == (n_points, C5)
    assert jnp.allclose(inten, ref_inten, atol=5e-2, rtol=5e-2)
    assert jnp.allclose(seg, ref_seg, atol=5e-2, rtol=5e-2)

    print("KERNEL_OK")
</pallas_src>

<mosaic_0001>
module attributes {stable_mosaic.version = 11 : i64} {
  func.func @_depth_reg_kernel(%arg0: i32, %arg1: memref<256x128xbf16, #tpu.memory_space<vmem>>, %arg2: memref<128x96xbf16, #tpu.memory_space<vmem>>, %arg3: memref<1x96xf32, #tpu.memory_space<vmem>>, %arg4: memref<96x64xbf16, #tpu.memory_space<vmem>>, %arg5: memref<1x64xf32, #tpu.memory_space<vmem>>, %arg6: memref<64x64xbf16, #tpu.memory_space<vmem>>, %arg7: memref<1x64xf32, #tpu.memory_space<vmem>>, %arg8: memref<64x32xbf16, #tpu.memory_space<vmem>>, %arg9: memref<1x32xf32, #tpu.memory_space<vmem>>, %arg10: memref<32x128xbf16, #tpu.memory_space<vmem>>, %arg11: memref<1x128xf32, #tpu.memory_space<vmem>>, %arg12: memref<256x128xf32, #tpu.memory_space<vmem>>) attributes {dimension_semantics = [#tpu.dimension_semantics<parallel>], iteration_bounds = array<i64: 8>, scalar_prefetch = 0 : i64, scratch_operands = 0 : i64, tpu.core_type = #tpu.core_type<tc>, window_params = [{transform_indices = @transform_0, window_bounds = array<i64: 256, 128>}, {pipeline_mode = #tpu.pipeline_mode<synchronous>, transform_indices = @transform_1, window_bounds = array<i64: 128, 96>}, {pipeline_mode = #tpu.pipeline_mode<synchronous>, transform_indices = @transform_2, window_bounds = array<i64: 1, 96>}, {pipeline_mode = #tpu.pipeline_mode<synchronous>, transform_indices = @transform_3, window_bounds = array<i64: 96, 64>}, {pipeline_mode = #tpu.pipeline_mode<synchronous>, transform_indices = @transform_4, window_bounds = array<i64: 1, 64>}, {pipeline_mode = #tpu.pipeline_mode<synchronous>, transform_indices = @transform_5, window_bounds = array<i64: 64, 64>}, {pipeline_mode = #tpu.pipeline_mode<synchronous>, transform_indices = @transform_6, window_bounds = array<i64: 1, 64>}, {pipeline_mode = #tpu.pipeline_mode<synchronous>, transform_indices = @transform_7, window_bounds = array<i64: 64, 32>}, {pipeline_mode = #tpu.pipeline_mode<synchronous>, transform_indices = @transform_8, window_bounds = array<i64: 1, 32>}, {pipeline_mode = #tpu.pipeline_mode<synchronous>, transform_indices = @transform_9, window_bounds = array<i64: 32, 128>}, {pipeline_mode = #tpu.pipeline_mode<synchronous>, transform_indices = @transform_10, window_bounds = array<i64: 1, 128>}, {transform_indices = @transform_11, window_bounds = array<i64: 256, 128>}]} {
    %c0 = arith.constant 0 : index
    %c0_0 = arith.constant 0 : index
    %0 = vector.load %arg1[%c0, %c0_0] : memref<256x128xbf16, #tpu.memory_space<vmem>>, vector<256x128xbf16>
    %c0_1 = arith.constant 0 : index
    %c0_2 = arith.constant 0 : index
    %1 = vector.load %arg2[%c0_1, %c0_2] : memref<128x96xbf16, #tpu.memory_space<vmem>>, vector<128x96xbf16>
    %cst = arith.constant dense<0.000000e+00> : vector<256x96xf32>
    %2 = tpu.matmul %0, %1, %cst {dimension_numbers = #tpu.dot_dimension_numbers<[1], [0], [0], [1], [0, 0, 1, 1], [], []>} : vector<256x128xbf16>, vector<128x96xbf16>, vector<256x96xf32> -> vector<256x96xf32>
    %c0_3 = arith.constant 0 : index
    %c0_4 = arith.constant 0 : index
    %3 = vector.load %arg3[%c0_3, %c0_4] : memref<1x96xf32, #tpu.memory_space<vmem>>, vector<1x96xf32>
    %4 = vector.broadcast %3 : vector<1x96xf32> to vector<256x96xf32>
    %5 = arith.addf %2, %4 : vector<256x96xf32>
    %cst_5 = arith.constant 0.000000e+00 : f32
    %6 = vector.broadcast %cst_5 : f32 to vector<256x96xf32>
    %7 = arith.maximumf %5, %6 : vector<256x96xf32>
    %8 = arith.truncf %7 : vector<256x96xf32> to vector<256x96xbf16>
    %c0_6 = arith.constant 0 : index
    %c0_7 = arith.constant 0 : index
    %9 = vector.load %arg4[%c0_6, %c0_7] : memref<96x64xbf16, #tpu.memory_space<vmem>>, vector<96x64xbf16>
    %cst_8 = arith.constant dense<0.000000e+00> : vector<256x64xf32>
    %10 = tpu.matmul %8, %9, %cst_8 {dimension_numbers = #tpu.dot_dimension_numbers<[1], [0], [0], [1], [0, 0, 1, 1], [], []>} : vector<256x96xbf16>, vector<96x64xbf16>, vector<256x64xf32> -> vector<256x64xf32>
    %c0_9 = arith.constant 0 : index
    %c0_10 = arith.constant 0 : index
    %11 = vector.load %arg5[%c0_9, %c0_10] : memref<1x64xf32, #tpu.memory_space<vmem>>, vector<1x64xf32>
    %12 = vector.broadcast %11 : vector<1x64xf32> to vector<256x64xf32>
    %13 = arith.addf %10, %12 : vector<256x64xf32>
    %cst_11 = arith.constant 0.000000e+00 : f32
    %14 = vector.broadcast %cst_11 : f32 to vector<256x64xf32>
    %15 = arith.maximumf %13, %14 : vector<256x64xf32>
    %16 = arith.truncf %15 : vector<256x64xf32> to vector<256x64xbf16>
    %c0_12 = arith.constant 0 : index
    %c0_13 = arith.constant 0 : index
    %17 = vector.load %arg6[%c0_12, %c0_13] : memref<64x64xbf16, #tpu.memory_space<vmem>>, vector<64x64xbf16>
    %cst_14 = arith.constant dense<0.000000e+00> : vector<256x64xf32>
    %18 = tpu.matmul %16, %17, %cst_14 {dimension_numbers = #tpu.dot_dimension_numbers<[1], [0], [0], [1], [0, 0, 1, 1], [], []>} : vector<256x64xbf16>, vector<64x64xbf16>, vector<256x64xf32> -> vector<256x64xf32>
    %c0_15 = arith.constant 0 : index
    %c0_16 = arith.constant 0 : index
    %19 = vector.load %arg7[%c0_15, %c0_16] : memref<1x64xf32, #tpu.memory_space<vmem>>, vector<1x64xf32>
    %20 = vector.broadcast %19 : vector<1x64xf32> to vector<256x64xf32>
    %21 = arith.addf %18, %20 : vector<256x64xf32>
    %cst_17 = arith.constant 0.000000e+00 : f32
    %22 = vector.broadcast %cst_17 : f32 to vector<256x64xf32>
    %23 = arith.maximumf %21, %22 : vector<256x64xf32>
    %24 = arith.truncf %23 : vector<256x64xf32> to vector<256x64xbf16>
    %c0_18 = arith.constant 0 : index
    %c0_19 = arith.constant 0 : index
    %25 = vector.load %arg8[%c0_18, %c0_19] : memref<64x32xbf16, #tpu.memory_space<vmem>>, vector<64x32xbf16>
    %cst_20 = arith.constant dense<0.000000e+00> : vector<256x32xf32>
    %26 = tpu.matmul %24, %25, %cst_20 {dimension_numbers = #tpu.dot_dimension_numbers<[1], [0], [0], [1], [0, 0, 1, 1], [], []>} : vector<256x64xbf16>, vector<64x32xbf16>, vector<256x32xf32> -> vector<256x32xf32>
    %c0_21 = arith.constant 0 : index
    %c0_22 = arith.constant 0 : index
    %27 = vector.load %arg9[%c0_21, %c0_22] : memref<1x32xf32, #tpu.memory_space<vmem>>, vector<1x32xf32>
    %28 = vector.broadcast %27 : vector<1x32xf32> to vector<256x32xf32>
    %29 = arith.addf %26, %28 : vector<256x32xf32>
    %cst_23 = arith.constant 0.000000e+00 : f32
    %30 = vector.broadcast %cst_23 : f32 to vector<256x32xf32>
    %31 = arith.maximumf %29, %30 : vector<256x32xf32>
    %32 = arith.truncf %31 : vector<256x32xf32> to vector<256x32xbf16>
    %c0_24 = arith.constant 0 : index
    %c0_25 = arith.constant 0 : index
    %33 = vector.load %arg10[%c0_24, %c0_25] : memref<32x128xbf16, #tpu.memory_space<vmem>>, vector<32x128xbf16>
    %cst_26 = arith.constant dense<0.000000e+00> : vector<256x128xf32>
    %34 = tpu.matmul %32, %33, %cst_26 {dimension_numbers = #tpu.dot_dimension_numbers<[1], [0], [0], [1], [0, 0, 1, 1], [], []>} : vector<256x32xbf16>, vector<32x128xbf16>, vector<256x128xf32> -> vector<256x128xf32>
    %c0_27 = arith.constant 0 : index
    %c0_28 = arith.constant 0 : index
    %35 = vector.load %arg11[%c0_27, %c0_28] : memref<1x128xf32, #tpu.memory_space<vmem>>, vector<1x128xf32>
    %36 = vector.broadcast %35 : vector<1x128xf32> to vector<256x128xf32>
    %37 = arith.addf %34, %36 : vector<256x128xf32>
    %cst_29 = arith.constant 0.000000e+00 : f32
    %38 = vector.broadcast %cst_29 : f32 to vector<256x128xf32>
    %39 = arith.maximumf %37, %38 : vector<256x128xf32>
    %c0_30 = arith.constant 0 : index
    %c0_31 = arith.constant 0 : index
    %40 = vector.load %arg12[%c0_30, %c0_31] : memref<256x128xf32, #tpu.memory_space<vmem>>, vector<256x128xf32>
    tpu.vector_store %arg12[%c0_30, %c0_31], %39 {strides = array<i32>} : memref<256x128xf32, #tpu.memory_space<vmem>>, vector<256x128xf32>,
    return
  }
  func.func @transform_0(%arg0: i32) -> (i32, i32) {
    %c0_i32 = arith.constant 0 : i32
    %c0_i32_0 = arith.constant 0 : i32
    return %arg0, %c0_i32 : i32, i32
  }
  func.func @transform_1(%arg0: i32) -> (i32, i32) {
    %c0_i32 = arith.constant 0 : i32
    %c0_i32_0 = arith.constant 0 : i32
    %c0_i32_1 = arith.constant 0 : i32
    return %c0_i32, %c0_i32_0 : i32, i32
  }
  func.func @transform_2(%arg0: i32) -> (i32, i32) {
    %c0_i32 = arith.constant 0 : i32
    %c0_i32_0 = arith.constant 0 : i32
    %c0_i32_1 = arith.constant 0 : i32
    return %c0_i32, %c0_i32_0 : i32, i32
  }
  func.func @transform_3(%arg0: i32) -> (i32, i32) {
    %c0_i32 = arith.constant 0 : i32
    %c0_i32_0 = arith.constant 0 : i32
    %c0_i32_1 = arith.constant 0 : i32
    return %c0_i32, %c0_i32_0 : i32, i32
  }
  func.func @transform_4(%arg0: i32) -> (i32, i32) {
    %c0_i32 = arith.constant 0 : i32
    %c0_i32_0 = arith.constant 0 : i32
    %c0_i32_1 = arith.constant 0 : i32
    return %c0_i32, %c0_i32_0 : i32, i32
  }
  func.func @transform_5(%arg0: i32) -> (i32, i32) {
    %c0_i32 = arith.constant 0 : i32
    %c0_i32_0 = arith.constant 0 : i32
    %c0_i32_1 = arith.constant 0 : i32
    return %c0_i32, %c0_i32_0 : i32, i32
  }
  func.func @transform_6(%arg0: i32) -> (i32, i32) {
    %c0_i32 = arith.constant 0 : i32
    %c0_i32_0 = arith.constant 0 : i32
    %c0_i32_1 = arith.constant 0 : i32
    return %c0_i32, %c0_i32_0 : i32, i32
  }
  func.func @transform_7(%arg0: i32) -> (i32, i32) {
    %c0_i32 = arith.constant 0 : i32
    %c0_i32_0 = arith.constant 0 : i32
    %c0_i32_1 = arith.constant 0 : i32
    return %c0_i32, %c0_i32_0 : i32, i32
  }
  func.func @transform_8(%arg0: i32) -> (i32, i32) {
    %c0_i32 = arith.constant 0 : i32
    %c0_i32_0 = arith.constant 0 : i32
    %c0_i32_1 = arith.constant 0 : i32
    return %c0_i32, %c0_i32_0 : i32, i32
  }
  func.func @transform_9(%arg0: i32) -> (i32, i32) {
    %c0_i32 = arith.constant 0 : i32
    %c0_i32_0 = arith.constant 0 : i32
    %c0_i32_1 = arith.constant 0 : i32
    return %c0_i32, %c0_i32_0 : i32, i32
  }
  func.func @transform_10(%arg0: i32) -> (i32, i32) {
    %c0_i32 = arith.constant 0 : i32
    %c0_i32_0 = arith.constant 0 : i32
    %c0_i32_1 = arith.constant 0 : i32
    return %c0_i32, %c0_i32_0 : i32, i32
  }
  func.func @transform_11(%arg0: i32) -> (i32, i32) {
    %c0_i32 = arith.constant 0 : i32
    %c0_i32_0 = arith.constant 0 : i32
    return %arg0, %c0_i32 : i32, i32
  }
}

</mosaic_0001>

<bundles_post_ra>
// kernel: depth_reg_forward.1
= control target key start
LH: loop header
LB: loop body
LE: loop exit
PB: predicated region body
PF: predicated region fallthrough
CT: control target
= control target key end

     0   :  { %s2053_s17 = smov 0   ;;  %s2480_s0 = inlined_call_operand.vmem [shape: bf16[2048,128], index: 0, kind: input, shape index: {}]   ;;  %s2481_s1 = inlined_call_operand.vmem [shape: bf16[128,96], index: 1, kind: input, shape index: {}]   ;;  %s2482_s2 = inlined_call_operand.vmem [shape: f32[1,96], index: 2, kind: input, shape index: {}]   ;;  %s2483_s3 = inlined_call_operand.vmem [shape: bf16[96,64], index: 3, kind: input, shape index: {}]   ;;  %s2484_s4 = inlined_call_operand.vmem [shape: f32[1,64], index: 4, kind: input, shape index: {}]   ;;  %s2485_s5 = inlined_call_operand.vmem [shape: bf16[64,64], index: 5, kind: input, shape index: {}]   ;;  %s2486_s6 = inlined_call_operand.vmem [shape: f32[1,64], index: 6, kind: input, shape index: {}]   ;;  %s2487_s7 = inlined_call_operand.vmem [shape: bf16[64,32], index: 7, kind: input, shape index: {}]   ;;  %s2488_s8 = inlined_call_operand.vmem [shape: f32[1,32], index: 8, kind: input, shape index: {}]   ;;  %s2489_s9 = inlined_call_operand.vmem [shape: bf16[32,128], index: 9, kind: input, shape index: {}]   ;;  %s2490_s10 = inlined_call_operand.vmem [shape: f32[1,128], index: 10, kind: input, shape index: {}]   ;;  %s2491_s11 = inlined_call_operand.vmem [shape: f32[2048,128], index: 11, kind: output, shape index: {}]  }
   0x1 LB: > { %s1683_s18 = sadd.s32 4294967295, %s1991_s17   ;;  %p1687_p0 = scmp.ge.s32.totalorder %s1991_s17, 1  ;;  %s1991_s17 = sphi %s2053_s17, %s21_s17  }
   0x2   : > { %p338_p1 = scmp.lt.s32.totalorder %s1991_s17, 9 }
   0x4   : > { %p339_p2 = pnand %p1687_p0, %p338_p1 }
   0x5   : > { %s1688_s29 = sshll.u32 (!%p339_p2), %s1683_s18, 5 }
   0x6   : > { %342 = sbr.rel (%p339_p2) target bundleno = 1110 (0x456), region = 64  ;;  %p379_p3 = scmp.lt.s32.totalorder (!%p339_p2), %s1688_s29, 255 }
   0xb   : > { %v1941_v0 = vld [vmem:[%s2481_s1 + $0x38] sm:$0xff]  ;;  %v1940_v1 = vld [vmem:[%s2481_s1 + $0x30] sm:$0xff]  ;;  %v1947_v2 = vld [vmem:[%s2483_s3 + $0x28] sm:$0xff]  ;;  %s2493_s29 = smov (!%p379_p3, %s1688_s29), 255  ;;  %vm776_vm0 = vcmask 785408   ;;  %vm998_vm1 = vcmask 523264  }
   0xc   : > { %587 = vmatpush.bf16.msra.mxu0 %v1941_v0  ;;  %1958 = vmatpush.bf16.msra.mxu1 %v1947_v2  ;;  %v1939_v3 = vld [vmem:[%s2481_s1 + $0x28] sm:$0xff]  ;;  %v1938_v4 = vld [vmem:[%s2481_s1 + $0x20] sm:$0xff]  ;;  %v1937_v5 = vld [vmem:[%s2481_s1 + $0x18] sm:$0xff]  ;;  %s1689_s18 = sshll.u32 %s2493_s29, 2  ;;  %vm1425_vm2 = vcmask 261120   ;;  %s1691_s12 = sshll.u32 %s2493_s29, 3 }
   0xd   : > { %v1936_v6 = vld [vmem:[%s2481_s1 + $0x10] sm:$0xff]  ;;  %v1935_v7 = vld [vmem:[%s2481_s1 + $0x8] sm:$0xff]  ;;  %v1934_v8 = vld [vmem:[%s2481_s1] sm:$0xff]  ;;  %s2094_s23 = scalar_lea.vmem %s2480_s0, %s1689_s18  ;;  %s2391_s15 = scalar_lea.vmem %s2491_s11, %s1691_s12 }
   0xe   : > { %v1918_v9 = vld [vmem:[%s2094_s23] sm:$0xff]  ;;  %v1919_v11 = vld [vmem:[%s2094_s23 + $0x8] sm:$0xff]  ;;  %v1920_v12 = vld [vmem:[%s2094_s23 + $0x10] sm:$0xff] }
   0xf   : > { %v1946_v10 = vld [vmem:[%s2483_s3 + $0x20] sm:$0xff]  ;;  %v1921_v13 = vld [vmem:[%s2094_s23 + $0x18] sm:$0xff]  ;;  %v1923_v16 = vld [vmem:[%s2094_s23 + $0x28] sm:$0xff] }
  0x10   : > { %588 = vmatpush.bf16.msra.mxu0 %v1940_v1  ;;  %1959 = vmatpush.bf16.msra.mxu1 %v1946_v10  ;;  %v1945_v14 = vld [vmem:[%s2483_s3 + $0x18] sm:$0xff]  ;;  %v1922_v15 = vld [vmem:[%s2094_s23 + $0x20] sm:$0xff]  ;;  %v1924_v17 = vld [vmem:[%s2094_s23 + $0x30] sm:$0xff] }
  0x11   : > { %v1944_v18 = vld [vmem:[%s2483_s3 + $0x10] sm:$0xff]  ;;  %v1925_v19 = vld [vmem:[%s2094_s23 + $0x38] sm:$0xff]  ;;  %v1926_v20 = vld [vmem:[%s2094_s23 + $0x40] sm:$0xff] }
  0x12   : > { %v2117_v22 = vld [vmem:[%s2482_s2] ss:$0 sm:$0xff]  ;;  %v1943_v23 = vld [vmem:[%s2483_s3 + $0x8] sm:$0xff]  ;;  %v1951_v32 = vld [vmem:[%s2485_s5 + $0x18] sm:$0xff] }
  0x13   : > { %v1942_v27 = vld [vmem:[%s2483_s3] sm:$0xff]  ;;  %v1927_v31 = vld [vmem:[%s2094_s23 + $0x48] sm:$0xff]  ;;  %1964 = vmatpush.bf16.msra.mxu2 %v1951_v32  ;;  %1965 = vmatpush.bf16.msra.mxu3 %v1951_v32  ;;  %v1928_v40 = vld [vmem:[%s2094_s23 + $0x50] sm:$0xff] }
  0x14   : > { %589 = vmatpush.bf16.msra.mxu0 %v1939_v3  ;;  %1960 = vmatpush.bf16.msra.mxu1 %v1945_v14  ;;  %v1929_v48 = vld [vmem:[%s2094_s23 + $0x58] sm:$0xff]  ;;  %v1930_v56 = vld [vmem:[%s2094_s23 + $0x60] sm:$0xff]  ;;  %v1950_v58 = vld [vmem:[%s2485_s5 + $0x10] sm:$0xff] }
  0x15   : > { %v1931_v1 = vld [vmem:[%s2094_s23 + $0x68] sm:$0xff] }
  0x17   : > { %1966 = vmatpush.bf16.msra.mxu2 %v1950_v58  ;;  %1967 = vmatpush.bf16.msra.mxu3 %v1950_v58 }
  0x18   : > { %590 = vmatpush.bf16.msra.mxu0 %v1938_v4  ;;  %1961 = vmatpush.bf16.msra.mxu1 %v1944_v18 }
  0x1c   : > { %591 = vmatpush.bf16.msra.mxu0 %v1937_v5  ;;  %1962 = vmatpush.bf16.msra.mxu1 %v1943_v23 }
  0x20   : > { %592 = vmatpush.bf16.msra.mxu0 %v1936_v6  ;;  %1963 = vmatpush.bf16.msra.mxu1 %v1942_v27 }
  0x24   : > { %593 = vmatpush.bf16.msra.mxu0 %v1935_v7  ;;  %1051 = vmatpush.bf16.msrb.mxu1 %v1951_v32 }
  0x28   : > { %594 = vmatpush.bf16.msra.mxu0 %v1934_v8  ;;  %1052 = vmatpush.bf16.msrb.mxu1 %v1950_v58 }
  0x2b   : > { %595 = vmatmul.bf16.vlgmr.msra.gmra.mxu0 %v1918_v9  ;;  %v1932_v9 = vld [vmem:[%s2094_s23 + $0x70] sm:$0xff] }
  0x2c   : > { %827 = vmatpush.bf16.msrb.mxu0 %v1947_v2 }
  0x30   : > { %828 = vmatpush.bf16.msrb.mxu0 %v1946_v10 }
  0x34   : > { %829 = vmatpush.bf16.msrb.mxu0 %v1945_v14 }
  0x38   : > { %830 = vmatpush.bf16.msrb.mxu0 %v1944_v18 }
  0x3b   : > { %600 = vmatmul.bf16.gmra.mxu0 %v1919_v11 }
  0x3c   : > { %831 = vmatpush.bf16.msrb.mxu0 %v1943_v23 }
  0x40   : > { %832 = vmatpush.bf16.msrb.mxu0 %v1942_v27 }
  0x4b   : > { %605 = vmatmul.bf16.gmra.mxu0 %v1920_v12 }
  0x5b   : > { %610 = vmatmul.bf16.gmra.mxu0 %v1921_v13 }
  0x6b   : > { %615 = vmatmul.bf16.gmra.mxu0 %v1922_v15 }
  0x7b   : > { %620 = vmatmul.bf16.gmra.mxu0 %v1923_v16 }
  0x8b   : > { %625 = vmatmul.bf16.gmra.mxu0 %v1924_v17  ;;  %v1933_v17 = vld [vmem:[%s2094_s23 + $0x78] sm:$0xff] }
  0x9b   : > { %630 = vmatmul.bf16.gmra.mxu0 %v1925_v19 }
  0xa8   : > { %v596_v21 = vpop.f32.mrf.mxu0 }
  0xa9   : > { %v597_v24 = vadd.f32 %v2117_v22, %v596_v21 }
  0xab   : > { %635 = vmatmul.bf16.gmra.mxu0 %v1926_v20  ;;  %v676_v28 = vmax.f32 %v597_v24, 0.0 }
  0xb0   : > { %v598_v25 = vpop.f32.mrf.mxu0 }
  0xb1   : > { %v599_v26 = vadd.f32 %v2117_v22, %v598_v25 }
  0xb3   : > { %v677_v29 = vmax.f32 %v599_v26, 0.0  ;;  %v1949_v26 = vld [vmem:[%s2485_s5 + $0x8] sm:$0xff] }
  0xb4   : > { %1053 = vmatpush.bf16.msrb.mxu1 %v1949_v26  ;;  %1968 = vmatpush.bf16.msra.mxu2 %v1949_v26 }
  0xb5   : > { %v2127_v30 = vpack.c.bf16 %v677_v29, %v676_v28  ;;  %1969 = vmatpush.bf16.msra.mxu3 %v1949_v26 }
  0xb8   : > { %v601_v33 = vpop.f32.mrf.mxu0 }
  0xb9   : > { %v602_v34 = vadd.f32 %v2117_v22, %v601_v33 }
  0xbb   : > { %640 = vmatmul.bf16.gmra.mxu0 %v1927_v31  ;;  %v678_v37 = vmax.f32 %v602_v34, 0.0 }
  0xc0   : > { %v603_v35 = vpop.f32.mrf.mxu0 }
  0xc1   : > { %v604_v36 = vadd.f32 %v2117_v22, %v603_v35 }
  0xc3   : > { %v679_v38 = vmax.f32 %v604_v36, 0.0 }
  0xc5   : > { %v2135_v39 = vpack.c.bf16 %v679_v38, %v678_v37 }
  0xc8   : > { %v606_v41 = vpop.f32.mrf.mxu0 }
  0xc9   : > { %v607_v42 = vadd.f32 %v2117_v22, %v606_v41 }
  0xcb   : > { %645 = vmatmul.bf16.gmra.mxu0 %v1928_v40  ;;  %v680_v45 = vmax.f32 %v607_v42, 0.0 }
  0xd0   : > { %v608_v43 = vpop.f32.mrf.mxu0 }
  0xd1   : > { %v609_v44 = vadd.f32 %v2117_v22, %v608_v43 }
  0xd3   : > { %v681_v46 = vmax.f32 %v609_v44, 0.0 }
  0xd5   : > { %v710_v47 = vpack.c.bf16 %v681_v46, %v680_v45 }
  0xd7   : > { %1814 = vmatmul.msk.bf16.vlgmr.msra.gmra.mxu1 %vm776_vm0, %v710_v47 }
  0xd8   : > { %v611_v49 = vpop.f32.mrf.mxu0 }
  0xd9   : > { %v612_v50 = vadd.f32 %v2117_v22, %v611_v49  ;;  %v2182_v49 = vld [vmem:[%s2484_s4] ss:$0 sm:$0xff] }
  0xdb   : > { %650 = vmatmul.bf16.gmra.mxu0 %v1929_v48  ;;  %v682_v53 = vmax.f32 %v612_v50, 0.0 }
  0xe0   : > { %v613_v51 = vpop.f32.mrf.mxu0 }
  0xe1   : > { %v614_v52 = vadd.f32 %v2117_v22, %v613_v51 }
  0xe3   : > { %v683_v54 = vmax.f32 %v614_v52, 0.0 }
  0xe5   : > { %v711_v55 = vpack.c.bf16 %v683_v54, %v682_v53 }
  0xe7   : > { %1815 = vmatmul.msk.bf16.gmra.mxu1 %vm776_vm0, %v711_v55 }
  0xe8   : > { %v616_v57 = vpop.f32.mrf.mxu0 }
  0xe9   : > { %v617_v59 = vadd.f32 %v2117_v22, %v616_v57 }
  0xeb   : > { %655 = vmatmul.bf16.gmra.mxu0 %v1930_v56  ;;  %v684_v62 = vmax.f32 %v617_v59, 0.0 }
  0xf0   : > { %v618_v60 = vpop.f32.mrf.mxu0 }
  0xf1   : > { %v619_v61 = vadd.f32 %v2117_v22, %v618_v60  ;;  %v1948_v60 = vld [vmem:[%s2485_s5] sm:$0xff] }
  0xf2   : > { %1054 = vmatpush.bf16.msrb.mxu1 %v1948_v60  ;;  %1970 = vmatpush.bf16.msra.mxu2 %v1948_v60 }
  0xf3   : > { %v685_v63 = vmax.f32 %v619_v61, 0.0  ;;  %1971 = vmatpush.bf16.msra.mxu3 %v1948_v60 }
  0xf5   : > { %v712_v0 = vpack.c.bf16 %v685_v63, %v684_v62 }
  0xf7   : > { %1816 = vmatmul.msk.bf16.gmra.mxu1 %vm776_vm0, %v712_v0 }
  0xf8   : > { %v621_v2 = vpop.f32.mrf.mxu0 }
  0xf9   : > { %v622_v3 = vadd.f32 %v2117_v22, %v621_v2 }
  0xfb   : > { %660 = vmatmul.bf16.gmra.mxu0 %v1931_v1  ;;  %v686_v6 = vmax.f32 %v622_v3, 0.0 }
 0x100   : > { %v623_v4 = vpop.f32.mrf.mxu0 }
 0x101   : > { %v624_v5 = vadd.f32 %v2117_v22, %v623_v4 }
 0x103   : > { %v687_v7 = vmax.f32 %v624_v5, 0.0 }
 0x105   : > { %v713_v8 = vpack.c.bf16 %v687_v7, %v686_v6 }
 0x107   : > { %1817 = vmatmul.msk.bf16.gmra.mxu1 %vm776_vm0, %v713_v8 }
 0x108   : > { %v626_v10 = vpop.f32.mrf.mxu0 }
 0x109   : > { %v627_v11 = vadd.f32 %v2117_v22, %v626_v10 }
 0x10b   : > { %665 = vmatmul.bf16.gmra.mxu0 %v1932_v9  ;;  %v688_v14 = vmax.f32 %v627_v11, 0.0 }
 0x110   : > { %v628_v12 = vpop.f32.mrf.mxu0 }
 0x111   : > { %v629_v13 = vadd.f32 %v2117_v22, %v628_v12 }
 0x113   : > { %v689_v15 = vmax.f32 %v629_v13, 0.0 }
 0x115   : > { %v714_v16 = vpack.c.bf16 %v689_v15, %v688_v14 }
 0x117   : > { %1818 = vmatmul.msk.bf16.gmra.mxu1 %vm776_vm0, %v714_v16 }
 0x118   : > { %v631_v18 = vpop.f32.mrf.mxu0 }
 0x119   : > { %v632_v19 = vadd.f32 %v2117_v22, %v631_v18 }
 0x11b   : > { %670 = vmatmul.bf16.gmra.mxu0 %v1933_v17  ;;  %v690_v23 = vmax.f32 %v632_v19, 0.0 }
 0x120   : > { %v633_v20 = vpop.f32.mrf.mxu0 }
 0x121   : > { %v634_v21 = vadd.f32 %v2117_v22, %v633_v20 }
 0x123   : > { %v691_v24 = vmax.f32 %v634_v21, 0.0 }
 0x125   : > { %v715_v25 = vpack.c.bf16 %v691_v24, %v690_v23 }
 0x127   : > { %1819 = vmatmul.msk.bf16.gmra.mxu1 %vm776_vm0, %v715_v25 }
 0x128   : > { %v636_v27 = vpop.f32.mrf.mxu0 }
 0x129   : > { %v637_v28 = vadd.f32 %v2117_v22, %v636_v27 }
 0x12b   : > { %1812 = vmatmul.msk.bf16.vlgmr.msrb.gmra.mxu0 %vm776_vm0, %v2127_v30  ;;  %v692_v32 = vmax.f32 %v637_v28, 0.0 }
 0x130   : > { %v638_v29 = vpop.f32.mrf.mxu0 }
 0x131   : > { %v639_v31 = vadd.f32 %v2117_v22, %v638_v29 }
 0x133   : > { %v693_v33 = vmax.f32 %v639_v31, 0.0 }
 0x135   : > { %v716_v34 = vpack.c.bf16 %v693_v33, %v692_v32 }
 0x137   : > { %1820 = vmatmul.msk.bf16.gmra.mxu1 %vm776_vm0, %v716_v34 }
 0x138   : > { %v641_v35 = vpop.f32.mrf.mxu0 }
 0x139   : > { %v642_v36 = vadd.f32 %v2117_v22, %v641_v35 }
 0x13b   : > { %1813 = vmatmul.msk.bf16.gmra.mxu0 %vm776_vm0, %v2135_v39  ;;  %v694_v30 = vmax.f32 %v642_v36, 0.0 }
 0x140   : > { %v643_v37 = vpop.f32.mrf.mxu0 }
 0x141   : > { %v644_v38 = vadd.f32 %v2117_v22, %v643_v37 }
 0x143   : > { %v695_v40 = vmax.f32 %v644_v38, 0.0 }
 0x145   : > { %v717_v41 = vpack.c.bf16 %v695_v40, %v694_v30 }
 0x147   : > { %1821 = vmatmul.msk.bf16.gmra.mxu1 %vm776_vm0, %v717_v41 }
 0x148   : > { %v646_v42 = vpop.f32.mrf.mxu0 }
 0x149   : > { %v647_v43 = vadd.f32 %v2117_v22, %v646_v42 }
 0x14b   : > { %v696_v46 = vmax.f32 %v647_v43, 0.0 }
 0x150   : > { %v648_v44 = vpop.f32.mrf.mxu0 }
 0x151   : > { %v649_v45 = vadd.f32 %v2117_v22, %v648_v44 }
 0x153   : > { %v697_v47 = vmax.f32 %v649_v45, 0.0 }
 0x154   : > { %v844_v48 = vpop.f32.mrf.mxu1 }
 0x155   : > { %v718_v39 = vpack.c.bf16 %v697_v47, %v696_v46  ;;  %v845_v51 = vadd.f32 %v2182_v49, %v844_v48 }
 0x157   : > { %1822 = vmatmul.msk.bf16.gmra.mxu1 %vm776_vm0, %v718_v39  ;;  %v918_v54 = vmax.f32 %v845_v51, 0.0 }
 0x158   : > { %v651_v50 = vpop.f32.mrf.mxu0 }
 0x159   : > { %v652_v55 = vadd.f32 %v2117_v22, %v651_v50 }
 0x15b   : > { %v698_v61 = vmax.f32 %v652_v55, 0.0 }
 0x15c   : > { %v846_v52 = vpop.f32.mrf.mxu1 }
 0x15d   : > { %v847_v53 = vadd.f32 %v2182_v49, %v846_v52 }
 0x15f   : > { %v919_v56 = vmax.f32 %v847_v53, 0.0 }
 0x160   : > { %v653_v57 = vpop.f32.mrf.mxu0 }
 0x161   : > { %v2188_v58 = vpack.c.bf16 %v919_v56, %v918_v54  ;;  %v654_v59 = vadd.f32 %v2117_v22, %v653_v57 }
 0x163   : > { %v699_v62 = vmax.f32 %v654_v59, 0.0 }
 0x164   : > { %v849_v63 = vpop.f32.mrf.mxu1 }
 0x165   : > { %v719_v0 = vpack.c.bf16 %v699_v62, %v698_v61  ;;  %v850_v2 = vadd.f32 %v2182_v49, %v849_v63 }
 0x167   : > { %1823 = vmatmul.msk.bf16.gmra.mxu1 %vm776_vm0, %v719_v0  ;;  %v920_v5 = vmax.f32 %v850_v2, 0.0 }
 0x168   : > { %v656_v1 = vpop.f32.mrf.mxu0 }
 0x169   : > { %v657_v6 = vadd.f32 %v2117_v22, %v656_v1 }
 0x16b   : > { %v700_v11 = vmax.f32 %v657_v6, 0.0 }
 0x16c   : > { %v851_v3 = vpop.f32.mrf.mxu1 }
 0x16d   : > { %v852_v4 = vadd.f32 %v2182_v49, %v851_v3 }
 0x16f   : > { %v921_v7 = vmax.f32 %v852_v4, 0.0 }
 0x170   : > { %v658_v8 = vpop.f32.mrf.mxu0 }
 0x171   : > { %v2198_v9 = vpack.c.bf16 %v921_v7, %v920_v5  ;;  %v659_v10 = vadd.f32 %v2117_v22, %v658_v8 }
 0x173   : > { %v701_v12 = vmax.f32 %v659_v10, 0.0 }
 0x174   : > { %v854_v13 = vpop.f32.mrf.mxu1 }
 0x175   : > { %v720_v14 = vpack.c.bf16 %v701_v12, %v700_v11  ;;  %v855_v16 = vadd.f32 %v2182_v49, %v854_v13 }
 0x177   : > { %1824 = vmatmul.msk.bf16.gmra.mxu1 %vm776_vm0, %v720_v14  ;;  %v922_v19 = vmax.f32 %v855_v16, 0.0 }
 0x178   : > { %v661_v15 = vpop.f32.mrf.mxu0 }
 0x179   : > { %v662_v20 = vadd.f32 %v2117_v22, %v661_v15 }
 0x17b   : > { %v702_v26 = vmax.f32 %v662_v20, 0.0 }
 0x17c   : > { %v856_v17 = vpop.f32.mrf.mxu1 }
 0x17d   : > { %v857_v18 = vadd.f32 %v2182_v49, %v856_v17 }
 0x17f   : > { %v923_v21 = vmax.f32 %v857_v18, 0.0 }
 0x180   : > { %v663_v23 = vpop.f32.mrf.mxu0 }
 0x181   : > { %v2205_v24 = vpack.c.bf16 %v923_v21, %v922_v19  ;;  %v664_v25 = vadd.f32 %v2117_v22, %v663_v23 }
 0x183   : > { %v703_v27 = vmax.f32 %v664_v25, 0.0 }
 0x184   : > { %v859_v28 = vpop.f32.mrf.mxu1 }
 0x185   : > { %v721_v29 = vpack.c.bf16 %v703_v27, %v702_v26  ;;  %v860_v32 = vadd.f32 %v2182_v49, %v859_v28 }
 0x187   : > { %1825 = vmatmul.msk.bf16.gmra.mxu1 %vm776_vm0, %v721_v29  ;;  %v924_v35 = vmax.f32 %v860_v32, 0.0 }
 0x188   : > { %v666_v31 = vpop.f32.mrf.mxu0 }
 0x189   : > { %v667_v36 = vadd.f32 %v2117_v22, %v666_v31 }
 0x18b   : > { %v704_v41 = vmax.f32 %v667_v36, 0.0 }
 0x18c   : > { %v861_v33 = vpop.f32.mrf.mxu1 }
 0x18d   : > { %v862_v34 = vadd.f32 %v2182_v49, %v861_v33  ;;  %v1955_v33 = vld [vmem:[%s2487_s7 + $0x18] sm:$0xff] }
 0x18e   : > { %1272 = vmatpush.bf16.msrb.mxu3 %v1955_v33 }
 0x18f   : > { %v925_v37 = vmax.f32 %v862_v34, 0.0 }
 0x190   : > { %v668_v38 = vpop.f32.mrf.mxu0 }
 0x191   : > { %v2212_v30 = vpack.c.bf16 %v925_v37, %v924_v35  ;;  %v669_v40 = vadd.f32 %v2117_v22, %v668_v38 }
 0x193   : > { %v705_v42 = vmax.f32 %v669_v40, 0.0 }
 0x194   : > { %v864_v43 = vpop.f32.mrf.mxu1 }
 0x195   : > { %v722_v44 = vpack.c.bf16 %v705_v42, %v704_v41  ;;  %v865_v46 = vadd.f32 %v2182_v49, %v864_v43  ;;  %v1954_v43 = vld [vmem:[%s2487_s7 + $0x10] sm:$0xff] }
 0x196   : > { %1273 = vmatpush.bf16.msrb.mxu3 %v1954_v43 }
 0x197   : > { %1826 = vmatmul.msk.bf16.gmra.mxu1 %vm776_vm0, %v722_v44  ;;  %v926_v39 = vmax.f32 %v865_v46, 0.0 }
 0x198   : > { %v671_v45 = vpop.f32.mrf.mxu0 }
 0x199   : > { %v672_v50 = vadd.f32 %v2117_v22, %v671_v45 }
 0x19b   : > { %v706_v55 = vmax.f32 %v672_v50, 0.0 }
 0x19c   : > { %v866_v47 = vpop.f32.mrf.mxu1 }
 0x19d   : > { %v867_v48 = vadd.f32 %v2182_v49, %v866_v47 }
 0x19f   : > { %v927_v51 = vmax.f32 %v867_v48, 0.0 }
 0x1a0   : > { %v673_v52 = vpop.f32.mrf.mxu0 }
 0x1a1   : > { %v674_v53 = vadd.f32 %v2117_v22, %v673_v52  ;;  %v952_v54 = vpack.c.bf16 %v927_v51, %v926_v39 }
 0x1a3   : > { %v707_v56 = vmax.f32 %v674_v53, 0.0  ;;  %1850 = vmatmul.msk.bf16.vlgmr.msra.gmra.mxu2 %vm998_vm1, %v952_v54 }
 0x1a4   : > { %v869_v57 = vpop.f32.mrf.mxu1 }
 0x1a5   : > { %v723_v59 = vpack.c.bf16 %v707_v56, %v706_v55  ;;  %v870_v61 = vadd.f32 %v2182_v49, %v869_v57 }
 0x1a7   : > { %1827 = vmatmul.msk.bf16.gmra.mxu1 %vm776_vm0, %v723_v59  ;;  %v928_v0 = vmax.f32 %v870_v61, 0.0 }
 0x1a8   : > { %v834_v60 = vpop.f32.mrf.mxu0 }
 0x1a9   : > { %v835_v1 = vadd.f32 %v2182_v49, %v834_v60 }
 0x1ab   : > { %v914_v5 = vmax.f32 %v835_v1, 0.0 }
 0x1ac   : > { %v871_v62 = vpop.f32.mrf.mxu1 }
 0x1ad   : > { %v872_v63 = vadd.f32 %v2182_v49, %v871_v62 }
 0x1af   : > { %v929_v2 = vmax.f32 %v872_v63, 0.0  ;;  %v1952_v63 = vld [vmem:[%s2487_s7] sm:$0xff] }
 0x1b0   : > { %v836_v22 = vpop.f32.mrf.mxu0 }
 0x1b1   : > { %v837_v3 = vadd.f32 %v2182_v49, %v836_v22  ;;  %v953_v4 = vpack.c.bf16 %v929_v2, %v928_v0 }
 0x1b3   : > { %v915_v6 = vmax.f32 %v837_v3, 0.0  ;;  %1851 = vmatmul.msk.bf16.gmra.mxu2 %vm998_vm1, %v953_v4 }
 0x1b4   : > { %v874_v7 = vpop.f32.mrf.mxu1 }
 0x1b5   : > { %v946_v8 = vpack.c.bf16 %v915_v6, %v914_v5  ;;  %v875_v11 = vadd.f32 %v2182_v49, %v874_v7 }
 0x1b7   : > { %1844 = vmatmul.msk.bf16.vlgmr.msrb.gmra.mxu1 %vm998_vm1, %v946_v8  ;;  %v930_v14 = vmax.f32 %v875_v11, 0.0 }
 0x1b8   : > { %v839_v10 = vpop.f32.mrf.mxu0 }
 0x1b9   : > { %v840_v15 = vadd.f32 %v2182_v49, %v839_v10 }
 0x1bb   : > { %v916_v20 = vmax.f32 %v840_v15, 0.0 }
 0x1bc   : > { %v876_v12 = vpop.f32.mrf.mxu1 }
 0x1bd   : > { %v877_v13 = vadd.f32 %v2182_v49, %v876_v12 }
 0x1bf   : > { %v931_v16 = vmax.f32 %v877_v13, 0.0 }
 0x1c0   : > { %v841_v17 = vpop.f32.mrf.mxu0 }
 0x1c1   : > { %v842_v18 = vadd.f32 %v2182_v49, %v841_v17  ;;  %v954_v19 = vpack.c.bf16 %v931_v16, %v930_v14  ;;  %v2278_v14 = vld [vmem:[%s2486_s6] ss:$0 sm:$0xff] }
 0x1c3   : > { %v917_v21 = vmax.f32 %v842_v18, 0.0  ;;  %1852 = vmatmul.msk.bf16.gmra.mxu2 %vm998_vm1, %v954_v19 }
 0x1c4   : > { %v879_v23 = vpop.f32.mrf.mxu1 }
 0x1c5   : > { %v947_v25 = vpack.c.bf16 %v917_v21, %v916_v20  ;;  %v880_v26 = vadd.f32 %v2182_v49, %v879_v23 }
 0x1c7   : > { %1845 = vmatmul.msk.bf16.gmra.mxu1 %vm998_vm1, %v947_v25  ;;  %v932_v29 = vmax.f32 %v880_v26, 0.0 }
 0x1cc   : > { %v881_v27 = vpop.f32.mrf.mxu1 }
 0x1cd   : > { %v882_v28 = vadd.f32 %v2182_v49, %v881_v27 }
 0x1cf   : > { %v933_v31 = vmax.f32 %v882_v28, 0.0 }
 0x1d1   : > { %v955_v32 = vpack.c.bf16 %v933_v31, %v932_v29 }
 0x1d3   : > { %1853 = vmatmul.msk.bf16.gmra.mxu2 %vm998_vm1, %v955_v32 }
 0x1d4   : > { %v884_v34 = vpop.f32.mrf.mxu1 }
 0x1d5   : > { %v885_v35 = vadd.f32 %v2182_v49, %v884_v34 }
 0x1d7   : > { %1846 = vmatmul.msk.bf16.gmra.mxu1 %vm998_vm1, %v2188_v58  ;;  %v934_v38 = vmax.f32 %v885_v35, 0.0 }
 0x1dc   : > { %v886_v36 = vpop.f32.mrf.mxu1 }
 0x1dd   : > { %v887_v37 = vadd.f32 %v2182_v49, %v886_v36 }
 0x1df   : > { %v935_v40 = vmax.f32 %v887_v37, 0.0 }
 0x1e1   : > { %v956_v41 = vpack.c.bf16 %v935_v40, %v934_v38  ;;  %v1957_v38 = vld [vmem:[%s2489_s9 + $0x8] sm:$0xff] }
 0x1e2   : > { %1480 = vmatpush.bf16.msrb.mxu2 %v1957_v38 }
 0x1e3   : > { %1854 = vmatmul.msk.bf16.gmra.mxu2 %vm998_vm1, %v956_v41 }
 0x1e4   : > { %v889_v42 = vpop.f32.mrf.mxu1 }
 0x1e5   : > { %v890_v58 = vadd.f32 %v2182_v49, %v889_v42 }
 0x1e7   : > { %1847 = vmatmul.msk.bf16.gmra.mxu1 %vm998_vm1, %v2198_v9  ;;  %v936_v46 = vmax.f32 %v890_v58, 0.0  ;;  %v1953_v9 = vld [vmem:[%s2487_s7 + $0x8] sm:$0xff] }
 0x1e8   : > { %1274 = vmatpush.bf16.msrb.mxu3 %v1953_v9 }
 0x1ec   : > { %v891_v44 = vpop.f32.mrf.mxu1  ;;  %1275 = vmatpush.bf16.msrb.mxu3 %v1952_v63 }
 0x1ed   : > { %v892_v45 = vadd.f32 %v2182_v49, %v891_v44 }
 0x1ef   : > { %v937_v47 = vmax.f32 %v892_v45, 0.0 }
 0x1f1   : > { %v957_v48 = vpack.c.bf16 %v937_v47, %v936_v46 }
 0x1f3   : > { %1855 = vmatmul.msk.bf16.vlgmr.msra.gmra.mxu3 %vm998_vm1, %v957_v48 }
 0x1f4   : > { %v894_v39 = vpop.f32.mrf.mxu1 }
 0x1f5   : > { %v895_v50 = vadd.f32 %v2182_v49, %v894_v39 }
 0x1f7   : > { %1848 = vmatmul.msk.bf16.gmra.mxu1 %vm998_vm1, %v2205_v24  ;;  %v938_v53 = vmax.f32 %v895_v50, 0.0 }
 0x1fc   : > { %v896_v51 = vpop.f32.mrf.mxu1 }
 0x1fd   : > { %v897_v52 = vadd.f32 %v2182_v49, %v896_v51 }
 0x1ff   : > { %v939_v54 = vmax.f32 %v897_v52, 0.0 }
 0x201   : > { %v958_v55 = vpack.c.bf16 %v939_v54, %v938_v53 }
 0x203   : > { %1856 = vmatmul.msk.bf16.gmra.mxu3 %vm998_vm1, %v958_v55 }
 0x204   : > { %v899_v56 = vpop.f32.mrf.mxu1 }
 0x205   : > { %v900_v24 = vadd.f32 %v2182_v49, %v899_v56 }
 0x207   : > { %1849 = vmatmul.msk.bf16.gmra.mxu1 %vm998_vm1, %v2212_v30  ;;  %v940_v60 = vmax.f32 %v900_v24, 0.0 }
 0x20c   : > { %v901_v57 = vpop.f32.mrf.mxu1 }
 0x20d   : > { %v902_v59 = vadd.f32 %v2182_v49, %v901_v57 }
 0x20f   : > { %v941_v61 = vmax.f32 %v902_v59, 0.0 }
 0x211   : > { %v959_v62 = vpack.c.bf16 %v941_v61, %v940_v60 }
 0x213   : > { %1857 = vmatmul.msk.bf16.gmra.mxu3 %vm998_vm1, %v959_v62  ;;  %v1956_v62 = vld [vmem:[%s2489_s9] sm:$0xff] }
 0x214   : > { %v904_v0 = vpop.f32.mrf.mxu1  ;;  %1481 = vmatpush.bf16.msrb.mxu2 %v1956_v62 }
 0x215   : > { %v905_v1 = vadd.f32 %v2182_v49, %v904_v0 }
 0x217   : > { %v942_v22 = vmax.f32 %v905_v1, 0.0 }
 0x21c   : > { %v906_v2 = vpop.f32.mrf.mxu1 }
 0x21d   : > { %v907_v30 = vadd.f32 %v2182_v49, %v906_v2 }
 0x21f   : > { %v943_v3 = vmax.f32 %v907_v30, 0.0 }
 0x221   : > { %v960_v4 = vpack.c.bf16 %v943_v3, %v942_v22 }
 0x223   : > { %1858 = vmatmul.msk.bf16.gmra.mxu3 %vm998_vm1, %v960_v4 }
 0x224   : > { %v909_v5 = vpop.f32.mrf.mxu1 }
 0x225   : > { %v910_v6 = vadd.f32 %v2182_v49, %v909_v5 }
 0x226   : > { %v1086_v48 = vpop.f32.mrf.mxu2 }
 0x227   : > { %v944_v10 = vmax.f32 %v910_v6, 0.0 }
 0x22c   : > { %v911_v7 = vpop.f32.mrf.mxu1 }
 0x22d   : > { %v912_v8 = vadd.f32 %v2182_v49, %v911_v7 }
 0x22e   : > { %v1088_v60 = vpop.f32.mrf.mxu2 }
 0x22f   : > { %v945_v11 = vmax.f32 %v912_v8, 0.0 }
 0x231   : > { %v961_v12 = vpack.c.bf16 %v945_v11, %v944_v10 }
 0x233   : > { %1859 = vmatmul.msk.bf16.gmra.mxu3 %vm998_vm1, %v961_v12  ;;  %v1089_v12 = vadd.f32 %v2278_v14, %v1088_v60 }
 0x234   : > { %v1056_v13 = vpop.f32.mrf.mxu1 }
 0x235   : > { %v1057_v15 = vadd.f32 %v2278_v14, %v1056_v13 }
 0x236   : > { %v1091_v5 = vpop.f32.mrf.mxu2 }
 0x237   : > { %v1136_v18 = vmax.f32 %v1057_v15, 0.0  ;;  %v1087_v15 = vadd.f32 %v2278_v14, %v1086_v48 }
 0x23c   : > { %v1058_v16 = vpop.f32.mrf.mxu1 }
 0x23d   : > { %v1059_v17 = vadd.f32 %v2278_v14, %v1058_v16  ;;  %v1149_v16 = vmax.f32 %v1089_v12, 0.0 }
 0x23e   : > { %v1093_v13 = vpop.f32.mrf.mxu2 }
 0x23f   : > { %v1137_v19 = vmax.f32 %v1059_v17, 0.0 }
 0x241   : > { %v1168_v20 = vpack.c.bf16 %v1137_v19, %v1136_v18  ;;  %v1148_v19 = vmax.f32 %v1087_v15, 0.0 }
 0x243   : > { %1876 = vmatmul.msk.bf16.vlgmr.msrb.gmra.mxu3 %vm998_vm1, %v1168_v20 }
 0x244   : > { %v1061_v49 = vpop.f32.mrf.mxu1 }
 0x245   : > { %v1062_v21 = vadd.f32 %v2278_v14, %v1061_v49 }
 0x247   : > { %v1138_v26 = vmax.f32 %v1062_v21, 0.0 }
 0x24c   : > { %v1063_v23 = vpop.f32.mrf.mxu1 }
 0x24d   : > { %v1064_v25 = vadd.f32 %v2278_v14, %v1063_v23  ;;  %v1174_v23 = vpack.c.bf16 %v1149_v16, %v1148_v19 }
 0x24f   : > { %v1139_v27 = vmax.f32 %v1064_v25, 0.0 }
 0x251   : > { %v1169_v28 = vpack.c.bf16 %v1139_v27, %v1138_v26  ;;  %v1096_v26 = vpop.f32.mrf.mxu2 }
 0x253   : > { %1877 = vmatmul.msk.bf16.gmra.mxu3 %vm998_vm1, %v1169_v28  ;;  %v1094_v28 = vadd.f32 %v2278_v14, %v1093_v13 }
 0x254   : > { %v1066_v29 = vpop.f32.mrf.mxu1 }
 0x255   : > { %v1067_v31 = vadd.f32 %v2278_v14, %v1066_v29  ;;  %v1092_v29 = vadd.f32 %v2278_v14, %v1091_v5 }
 0x257   : > { %v1140_v34 = vmax.f32 %v1067_v31, 0.0  ;;  %v1151_v31 = vmax.f32 %v1094_v28, 0.0 }
 0x25c   : > { %v1068_v32 = vpop.f32.mrf.mxu1 }
 0x25d   : > { %v1069_v33 = vadd.f32 %v2278_v14, %v1068_v32 }
 0x25f   : > { %v1141_v35 = vmax.f32 %v1069_v33, 0.0  ;;  %v1098_v33 = vpop.f32.mrf.mxu2 }
 0x261   : > { %v1170_v36 = vpack.c.bf16 %v1141_v35, %v1140_v34  ;;  %v1150_v35 = vmax.f32 %v1092_v29, 0.0 }
 0x263   : > { %1878 = vmatmul.msk.bf16.gmra.mxu3 %vm998_vm1, %v1170_v36 }
 0x264   : > { %v1071_v37 = vpop.f32.mrf.mxu1 }
 0x265   : > { %v1072_v40 = vadd.f32 %v2278_v14, %v1071_v37  ;;  %v1175_v37 = vpack.c.bf16 %v1151_v31, %v1150_v35 }
 0x267   : > { %v1142_v43 = vmax.f32 %v1072_v40, 0.0 }
 0x26c   : > { %v1073_v41 = vpop.f32.mrf.mxu1 }
 0x26d   : > { %v1074_v42 = vadd.f32 %v2278_v14, %v1073_v41 }
 0x26f   : > { %v1143_v58 = vmax.f32 %v1074_v42, 0.0 }
 0x271   : > { %v1171_v44 = vpack.c.bf16 %v1143_v58, %v1142_v43  ;;  %v1101_v43 = vpop.f32.mrf.mxu2  ;;  %v1099_v58 = vadd.f32 %v2278_v14, %v1098_v33 }
 0x273   : > { %1879 = vmatmul.msk.bf16.gmra.mxu3 %vm998_vm1, %v1171_v44  ;;  %v1097_v44 = vadd.f32 %v2278_v14, %v1096_v26 }
 0x274   : > { %v1076_v45 = vpop.f32.mrf.mxu1 }
 0x275   : > { %v1077_v47 = vadd.f32 %v2278_v14, %v1076_v45  ;;  %v1153_v45 = vmax.f32 %v1099_v58, 0.0  ;;  %v1152_v48 = vmax.f32 %v1097_v44, 0.0 }
 0x276   : > { %v1111_v46 = vpop.f32.mrf.mxu3 }
 0x277   : > { %v1112_v9 = vadd.f32 %v2278_v14, %v1111_v46  ;;  %v1144_v52 = vmax.f32 %v1077_v47, 0.0 }
 0x279   : > { %v1158_v55 = vmax.f32 %v1112_v9, 0.0  ;;  %v1176_v9 = vpack.c.bf16 %v1153_v45, %v1152_v48 }
 0x27c   : > { %v1078_v39 = vpop.f32.mrf.mxu1 }
 0x27d   : > { %v1079_v50 = vadd.f32 %v2278_v14, %v1078_v39 }
 0x27e   : > { %v1113_v51 = vpop.f32.mrf.mxu3 }
 0x27f   : > { %v1145_v53 = vmax.f32 %v1079_v50, 0.0  ;;  %v1114_v54 = vadd.f32 %v2278_v14, %v1113_v51 }
 0x281   : > { %v1172_v56 = vpack.c.bf16 %v1145_v53, %v1144_v52  ;;  %v1159_v24 = vmax.f32 %v1114_v54, 0.0  ;;  %v1103_v52 = vpop.f32.mrf.mxu2 }
 0x283   : > { %v2299_v57 = vpack.c.bf16 %v1159_v24, %v1158_v55  ;;  %1880 = vmatmul.msk.bf16.gmra.mxu3 %vm998_vm1, %v1172_v56  ;;  %v1104_v55 = vadd.f32 %v2278_v14, %v1103_v52  ;;  %v2337_v56 = vld [vmem:[%s2488_s8] ss:$0 sm:$0xff]  ;;  %v1102_v24 = vadd.f32 %v2278_v14, %v1101_v43 }
 0x284   : > { %v1081_v59 = vpop.f32.mrf.mxu1 }
 0x285   : > { %v1082_v63 = vadd.f32 %v2278_v14, %v1081_v59  ;;  %v1155_v60 = vmax.f32 %v1104_v55, 0.0 }
 0x286   : > { %v1116_v61 = vpop.f32.mrf.mxu3 }
 0x287   : > { %v1117_v1 = vadd.f32 %v2278_v14, %v1116_v61  ;;  %v1146_v22 = vmax.f32 %v1082_v63, 0.0  ;;  %v1154_v63 = vmax.f32 %v1102_v24, 0.0 }
 0x289   : > { %v1160_v6 = vmax.f32 %v1117_v1, 0.0  ;;  %v1106_v59 = vpop.f32.mrf.mxu2  ;;  %v1177_v1 = vpack.c.bf16 %v1155_v60, %v1154_v63 }
 0x28c   : > { %v1083_v0 = vpop.f32.mrf.mxu1 }
 0x28d   : > { %v1084_v2 = vadd.f32 %v2278_v14, %v1083_v0 }
 0x28e   : > { %v1118_v30 = vpop.f32.mrf.mxu3 }
 0x28f   : > { %v1147_v3 = vmax.f32 %v1084_v2, 0.0  ;;  %v1119_v4 = vadd.f32 %v2278_v14, %v1118_v30 }
 0x291   : > { %v1173_v7 = vpack.c.bf16 %v1147_v3, %v1146_v22  ;;  %v1161_v8 = vmax.f32 %v1119_v4, 0.0  ;;  %v1108_v3 = vpop.f32.mrf.mxu2 }
 0x292   : > { %v1109_v5 = vadd.f32 %v2278_v14, %v1108_v3 }
 0x293   : > { %v2309_v10 = vpack.c.bf16 %v1161_v8, %v1160_v6  ;;  %1881 = vmatmul.msk.bf16.gmra.mxu3 %vm998_vm1, %v1173_v7  ;;  %v1107_v6 = vadd.f32 %v2278_v14, %v1106_v59 }
 0x294   : > { %v1157_v7 = vmax.f32 %v1109_v5, 0.0 }
 0x295   : > { %v1156_v12 = vmax.f32 %v1107_v6, 0.0 }
 0x296   : > { %v1121_v11 = vpop.f32.mrf.mxu3 }
 0x297   : > { %v1122_v17 = vadd.f32 %v2278_v14, %v1121_v11  ;;  %v1178_v15 = vpack.c.bf16 %v1157_v7, %v1156_v12 }
 0x299   : > { %v1162_v49 = vmax.f32 %v1122_v17, 0.0 }
 0x29e   : > { %v1123_v18 = vpop.f32.mrf.mxu3 }
 0x29f   : > { %v1124_v20 = vadd.f32 %v2278_v14, %v1123_v18 }
 0x2a1   : > { %v1163_v21 = vmax.f32 %v1124_v20, 0.0 }
 0x2a3   : > { %v2316_v25 = vpack.c.bf16 %v1163_v21, %v1162_v49  ;;  %1882 = vmatmul.msk.bf16.gmra.mxu3 %vm998_vm1, %v1174_v23 }
 0x2a6   : > { %v1126_v27 = vpop.f32.mrf.mxu3 }
 0x2a7   : > { %v1127_v32 = vadd.f32 %v2278_v14, %v1126_v27 }
 0x2a9   : > { %v1164_v38 = vmax.f32 %v1127_v32, 0.0 }
 0x2ae   : > { %v1128_v34 = vpop.f32.mrf.mxu3 }
 0x2af   : > { %v1129_v36 = vadd.f32 %v2278_v14, %v1128_v34 }
 0x2b1   : > { %v1165_v40 = vmax.f32 %v1129_v36, 0.0 }
 0x2b3   : > { %v2323_v41 = vpack.c.bf16 %v1165_v40, %v1164_v38  ;;  %1883 = vmatmul.msk.bf16.gmra.mxu3 %vm998_vm1, %v1175_v37 }
 0x2b6   : > { %v1131_v42 = vpop.f32.mrf.mxu3 }
 0x2b7   : > { %v1132_v46 = vadd.f32 %v2278_v14, %v1131_v42 }
 0x2b9   : > { %v1166_v50 = vmax.f32 %v1132_v46, 0.0 }
 0x2be   : > { %v1133_v47 = vpop.f32.mrf.mxu3 }
 0x2bf   : > { %v1134_v39 = vadd.f32 %v2278_v14, %v1133_v47 }
 0x2c1   : > { %v1167_v51 = vmax.f32 %v1134_v39, 0.0 }
 0x2c3   : > { %v2330_v53 = vpack.c.bf16 %v1167_v51, %v1166_v50  ;;  %1884 = vmatmul.msk.bf16.gmra.mxu3 %vm998_vm1, %v1176_v9 }
 0x2c6   : > { %v1277_v54 = vpop.f32.mrf.mxu3 }
 0x2c7   : > { %v1278_v61 = vadd.f32 %v2337_v56, %v1277_v54 }
 0x2c9   : > { %v1357_v2 = vmax.f32 %v1278_v61, 0.0 }
 0x2ce   : > { %v1279_v62 = vpop.f32.mrf.mxu3 }
 0x2cf   : > { %v1280_v0 = vadd.f32 %v2337_v56, %v1279_v62 }
 0x2d1   : > { %v1358_v30 = vmax.f32 %v1280_v0, 0.0 }
 0x2d3   : > { %v1389_v22 = vpack.c.bf16 %v1358_v30, %v1357_v2  ;;  %1885 = vmatmul.msk.bf16.gmra.mxu3 %vm998_vm1, %v1177_v1 }
 0x2d5   : > { %1900 = vmatmul.msk.bf16.vlgmr.msrb.gmra.mxu2 %vm1425_vm2, %v1389_v22  ;;  %v2384_v22 = vld [vmem:[%s2490_s10] ss:$0 sm:$0xff] }
 0x2d6   : > { %v1282_v4 = vpop.f32.mrf.mxu3 }
 0x2d7   : > { %v1283_v8 = vadd.f32 %v2337_v56, %v1282_v4 }
 0x2d9   : > { %v1359_v16 = vmax.f32 %v1283_v8, 0.0 }
 0x2de   : > { %v1284_v11 = vpop.f32.mrf.mxu3 }
 0x2df   : > { %v1285_v13 = vadd.f32 %v2337_v56, %v1284_v11 }
 0x2e1   : > { %v1360_v17 = vmax.f32 %v1285_v13, 0.0 }
 0x2e3   : > { %1886 = vmatmul.msk.bf16.gmra.mxu3 %vm998_vm1, %v1178_v15  ;;  %v1390_v18 = vpack.c.bf16 %v1360_v17, %v1359_v16 }
 0x2e5   : > { %1901 = vmatmul.msk.bf16.gmra.mxu2 %vm1425_vm2, %v1390_v18 }
 0x2e6   : > { %v1287_v19 = vpop.f32.mrf.mxu3 }
 0x2e7   : > { %v1288_v20 = vadd.f32 %v2337_v56, %v1287_v19 }
 0x2e9   : > { %v1361_v21 = vmax.f32 %v1288_v20, 0.0 }
 0x2ee   : > { %v1289_v49 = vpop.f32.mrf.mxu3 }
 0x2ef   : > { %v1290_v14 = vadd.f32 %v2337_v56, %v1289_v49 }
 0x2f1   : > { %v1362_v23 = vmax.f32 %v1290_v14, 0.0 }
 0x2f3   : > { %1887 = vmatmul.msk.bf16.gmra.mxu3 %vm998_vm1, %v2299_v57  ;;  %v1391_v26 = vpack.c.bf16 %v1362_v23, %v1361_v21 }
 0x2f5   : > { %1902 = vmatmul.msk.bf16.gmra.mxu2 %vm1425_vm2, %v1391_v26 }
 0x2f6   : > { %v1292_v27 = vpop.f32.mrf.mxu3 }
 0x2f7   : > { %v1293_v28 = vadd.f32 %v2337_v56, %v1292_v27 }
 0x2f9   : > { %v1363_v32 = vmax.f32 %v1293_v28, 0.0 }
 0x2fe   : > { %v1294_v29 = vpop.f32.mrf.mxu3 }
 0x2ff   : > { %v1295_v31 = vadd.f32 %v2337_v56, %v1294_v29 }
 0x301   : > { %v1364_v33 = vmax.f32 %v1295_v31, 0.0 }
 0x303   : > { %1888 = vmatmul.msk.bf16.gmra.mxu3 %vm998_vm1, %v2309_v10  ;;  %v1392_v34 = vpack.c.bf16 %v1364_v33, %v1363_v32 }
 0x305   : > { %1903 = vmatmul.msk.bf16.gmra.mxu2 %vm1425_vm2, %v1392_v34 }
 0x306   : > { %v1297_v35 = vpop.f32.mrf.mxu3 }
 0x307   : > { %v1298_v57 = vadd.f32 %v2337_v56, %v1297_v35 }
 0x309   : > { %v1365_v38 = vmax.f32 %v1298_v57, 0.0 }
 0x30e   : > { %v1299_v36 = vpop.f32.mrf.mxu3 }
 0x30f   : > { %v1300_v37 = vadd.f32 %v2337_v56, %v1299_v36 }
 0x311   : > { %v1366_v40 = vmax.f32 %v1300_v37, 0.0 }
 0x313   : > { %v1393_v42 = vpack.c.bf16 %v1366_v40, %v1365_v38  ;;  %1889 = vmatmul.msk.bf16.gmra.mxu3 %vm998_vm1, %v2316_v25 }
 0x315   : > { %1904 = vmatmul.msk.bf16.gmra.mxu2 %vm1425_vm2, %v1393_v42 }
 0x316   : > { %v1302_v43 = vpop.f32.mrf.mxu3 }
 0x317   : > { %v1303_v10 = vadd.f32 %v2337_v56, %v1302_v43 }
 0x319   : > { %v1367_v45 = vmax.f32 %v1303_v10, 0.0 }
 0x31e   : > { %v1304_v58 = vpop.f32.mrf.mxu3 }
 0x31f   : > { %v1305_v44 = vadd.f32 %v2337_v56, %v1304_v58 }
 0x321   : > { %v1368_v46 = vmax.f32 %v1305_v44, 0.0 }
 0x323   : > { %v1394_v47 = vpack.c.bf16 %v1368_v46, %v1367_v45  ;;  %1890 = vmatmul.msk.bf16.gmra.mxu3 %vm998_vm1, %v2323_v41 }
 0x325   : > { %1905 = vmatmul.msk.bf16.gmra.mxu2 %vm1425_vm2, %v1394_v47 }
 0x326   : > { %v1307_v48 = vpop.f32.mrf.mxu3 }
 0x327   : > { %v1308_v39 = vadd.f32 %v2337_v56, %v1307_v48 }
 0x329   : > { %v1369_v50 = vmax.f32 %v1308_v39, 0.0 }
 0x32e   : > { %v1309_v25 = vpop.f32.mrf.mxu3 }
 0x32f   : > { %v1310_v9 = vadd.f32 %v2337_v56, %v1309_v25 }
 0x331   : > { %v1370_v51 = vmax.f32 %v1310_v9, 0.0 }
 0x333   : > { %v1395_v52 = vpack.c.bf16 %v1370_v51, %v1369_v50  ;;  %1891 = vmatmul.msk.bf16.gmra.mxu3 %vm998_vm1, %v2330_v53 }
 0x335   : > { %1906 = vmatmul.msk.bf16.gmra.mxu2 %vm1425_vm2, %v1395_v52 }
 0x336   : > { %v1312_v54 = vpop.f32.mrf.mxu3 }
 0x337   : > { %v1313_v55 = vadd.f32 %v2337_v56, %v1312_v54 }
 0x339   : > { %v1371_v59 = vmax.f32 %v1313_v55, 0.0 }
 0x33e   : > { %v1314_v41 = vpop.f32.mrf.mxu3 }
 0x33f   : > { %v1315_v24 = vadd.f32 %v2337_v56, %v1314_v41 }
 0x341   : > { %v1372_v60 = vmax.f32 %v1315_v24, 0.0 }
 0x343   : > { %v1396_v61 = vpack.c.bf16 %v1372_v60, %v1371_v59 }
 0x345   : > { %1907 = vmatmul.msk.bf16.gmra.mxu2 %vm1425_vm2, %v1396_v61 }
 0x346   : > { %v1317_v62 = vpop.f32.mrf.mxu3 }
 0x347   : > { %v1318_v63 = vadd.f32 %v2337_v56, %v1317_v62 }
 0x349   : > { %v1373_v1 = vmax.f32 %v1318_v63, 0.0 }
 0x34e   : > { %v1319_v0 = vpop.f32.mrf.mxu3 }
 0x34f   : > { %v1320_v53 = vadd.f32 %v2337_v56, %v1319_v0 }
 0x351   : > { %v1374_v2 = vmax.f32 %v1320_v53, 0.0 }
 0x353   : > { %v1397_v30 = vpack.c.bf16 %v1374_v2, %v1373_v1 }
 0x355   : > { %1908 = vmatmul.msk.bf16.gmra.mxu2 %vm1425_vm2, %v1397_v30 }
 0x356   : > { %v1322_v3 = vpop.f32.mrf.mxu3 }
 0x357   : > { %v1323_v7 = vadd.f32 %v2337_v56, %v1322_v3 }
 0x358   : > { %v1483_v4 = vpop.f32.mrf.mxu2 }
 0x359   : > { %v1484_v5 = vadd.f32 %v2384_v22, %v1483_v4  ;;  %v1375_v13 = vmax.f32 %v1323_v7, 0.0 }
 0x35b   : > { %v1563_v6 = vmax.f32 %v1484_v5, 0.0 }
 0x35d   : > { %1595 = vst [vmem:[%s2391_s15] sm:$0xff] %v1563_v6 }
 0x35e   : > { %v1324_v8 = vpop.f32.mrf.mxu3 }
 0x35f   : > { %v1325_v11 = vadd.f32 %v2337_v56, %v1324_v8 }
 0x360   : > { %v1485_v12 = vpop.f32.mrf.mxu2 }
 0x361   : > { %v1376_v15 = vmax.f32 %v1325_v11, 0.0  ;;  %v1486_v16 = vadd.f32 %v2384_v22, %v1485_v12 }
 0x363   : > { %v1398_v17 = vpack.c.bf16 %v1376_v15, %v1375_v13  ;;  %v1564_v18 = vmax.f32 %v1486_v16, 0.0 }
 0x365   : > { %1596 = vst [vmem:[%s2391_s15 + $0x8] sm:$0xff] %v1564_v18  ;;  %1909 = vmatmul.msk.bf16.gmra.mxu2 %vm1425_vm2, %v1398_v17 }
 0x366   : > { %v1327_v19 = vpop.f32.mrf.mxu3 }
 0x367   : > { %v1328_v21 = vadd.f32 %v2337_v56, %v1327_v19 }
 0x368   : > { %v1488_v20 = vpop.f32.mrf.mxu2 }
 0x369   : > { %v1489_v49 = vadd.f32 %v2384_v22, %v1488_v20  ;;  %v1377_v28 = vmax.f32 %v1328_v21, 0.0 }
 0x36b   : > { %v1565_v14 = vmax.f32 %v1489_v49, 0.0 }
 0x36d   : > { %1597 = vst [vmem:[%s2391_s15 + $0x10] sm:$0xff] %v1565_v14 }
 0x36e   : > { %v1329_v23 = vpop.f32.mrf.mxu3 }
 0x36f   : > { %v1330_v26 = vadd.f32 %v2337_v56, %v1329_v23 }
 0x370   : > { %v1490_v27 = vpop.f32.mrf.mxu2 }
 0x371   : > { %v1378_v29 = vmax.f32 %v1330_v26, 0.0  ;;  %v1491_v31 = vadd.f32 %v2384_v22, %v1490_v27 }
 0x373   : > { %v1399_v32 = vpack.c.bf16 %v1378_v29, %v1377_v28  ;;  %v1566_v33 = vmax.f32 %v1491_v31, 0.0 }
 0x375   : > { %1598 = vst [vmem:[%s2391_s15 + $0x18] sm:$0xff] %v1566_v33  ;;  %1910 = vmatmul.msk.bf16.gmra.mxu2 %vm1425_vm2, %v1399_v32 }
 0x376   : > { %v1332_v34 = vpop.f32.mrf.mxu3 }
 0x377   : > { %v1333_v37 = vadd.f32 %v2337_v56, %v1332_v34 }
 0x378   : > { %v1493_v35 = vpop.f32.mrf.mxu2 }
 0x379   : > { %v1494_v57 = vadd.f32 %v2384_v22, %v1493_v35  ;;  %v1379_v43 = vmax.f32 %v1333_v37, 0.0 }
 0x37b   : > { %v1567_v36 = vmax.f32 %v1494_v57, 0.0 }
 0x37d   : > { %1599 = vst [vmem:[%s2391_s15 + $0x20] sm:$0xff] %v1567_v36 }
 0x37e   : > { %v1334_v38 = vpop.f32.mrf.mxu3 }
 0x37f   : > { %v1335_v40 = vadd.f32 %v2337_v56, %v1334_v38 }
 0x380   : > { %v1495_v42 = vpop.f32.mrf.mxu2 }
 0x381   : > { %v1380_v10 = vmax.f32 %v1335_v40, 0.0  ;;  %v1496_v58 = vadd.f32 %v2384_v22, %v1495_v42 }
 0x383   : > { %v1400_v44 = vpack.c.bf16 %v1380_v10, %v1379_v43  ;;  %v1568_v45 = vmax.f32 %v1496_v58, 0.0 }
 0x385   : > { %1600 = vst [vmem:[%s2391_s15 + $0x28] sm:$0xff] %v1568_v45  ;;  %1911 = vmatmul.msk.bf16.gmra.mxu2 %vm1425_vm2, %v1400_v44 }
 0x386   : > { %v1337_v46 = vpop.f32.mrf.mxu3 }
 0x387   : > { %v1338_v25 = vadd.f32 %v2337_v56, %v1337_v46 }
 0x388   : > { %v1498_v47 = vpop.f32.mrf.mxu2 }
 0x389   : > { %v1499_v48 = vadd.f32 %v2384_v22, %v1498_v47  ;;  %v1381_v52 = vmax.f32 %v1338_v25, 0.0 }
 0x38b   : > { %v1569_v39 = vmax.f32 %v1499_v48, 0.0 }
 0x38d   : > { %1601 = vst [vmem:[%s2391_s15 + $0x30] sm:$0xff] %v1569_v39 }
 0x38e   : > { %v1339_v9 = vpop.f32.mrf.mxu3 }
 0x38f   : > { %v1340_v50 = vadd.f32 %v2337_v56, %v1339_v9 }
 0x390   : > { %v1500_v51 = vpop.f32.mrf.mxu2 }
 0x391   : > { %v1382_v54 = vmax.f32 %v1340_v50, 0.0  ;;  %v1501_v55 = vadd.f32 %v2384_v22, %v1500_v51 }
 0x393   : > { %v1401_v41 = vpack.c.bf16 %v1382_v54, %v1381_v52  ;;  %v1570_v24 = vmax.f32 %v1501_v55, 0.0 }
 0x395   : > { %1602 = vst [vmem:[%s2391_s15 + $0x38] sm:$0xff] %v1570_v24  ;;  %1912 = vmatmul.msk.bf16.gmra.mxu2 %vm1425_vm2, %v1401_v41 }
 0x396   : > { %v1342_v59 = vpop.f32.mrf.mxu3 }
 0x397   : > { %v1343_v63 = vadd.f32 %v2337_v56, %v1342_v59 }
 0x398   : > { %v1503_v60 = vpop.f32.mrf.mxu2 }
 0x399   : > { %v1504_v61 = vadd.f32 %v2384_v22, %v1503_v60  ;;  %v1383_v2 = vmax.f32 %v1343_v63, 0.0 }
 0x39b   : > { %v1571_v62 = vmax.f32 %v1504_v61, 0.0 }
 0x39d   : > { %1603 = vst [vmem:[%s2391_s15 + $0x40] sm:$0xff] %v1571_v62 }
 0x39e   : > { %v1344_v0 = vpop.f32.mrf.mxu3 }
 0x39f   : > { %v1345_v53 = vadd.f32 %v2337_v56, %v1344_v0 }
 0x3a0   : > { %v1505_v1 = vpop.f32.mrf.mxu2 }
 0x3a1   : > { %v1384_v30 = vmax.f32 %v1345_v53, 0.0  ;;  %v1506_v3 = vadd.f32 %v2384_v22, %v1505_v1 }
 0x3a3   : > { %v1402_v4 = vpack.c.bf16 %v1384_v30, %v1383_v2  ;;  %v1572_v5 = vmax.f32 %v1506_v3, 0.0 }
 0x3a5   : > { %1604 = vst [vmem:[%s2391_s15 + $0x48] sm:$0xff] %v1572_v5  ;;  %1913 = vmatmul.msk.bf16.gmra.mxu2 %vm1425_vm2, %v1402_v4 }
 0x3a6   : > { %v1347_v6 = vpop.f32.mrf.mxu3 }
 0x3a7   : > { %v1348_v12 = vadd.f32 %v2337_v56, %v1347_v6 }
 0x3a8   : > { %v1508_v7 = vpop.f32.mrf.mxu2 }
 0x3a9   : > { %v1509_v8 = vadd.f32 %v2384_v22, %v1508_v7  ;;  %v1385_v17 = vmax.f32 %v1348_v12, 0.0 }
 0x3ab   : > { %v1573_v11 = vmax.f32 %v1509_v8, 0.0 }
 0x3ad   : > { %1605 = vst [vmem:[%s2391_s15 + $0x50] sm:$0xff] %v1573_v11 }
 0x3ae   : > { %v1349_v13 = vpop.f32.mrf.mxu3 }
 0x3af   : > { %v1350_v15 = vadd.f32 %v2337_v56, %v1349_v13 }
 0x3b0   : > { %v1510_v16 = vpop.f32.mrf.mxu2 }
 0x3b1   : > { %v1386_v18 = vmax.f32 %v1350_v15, 0.0  ;;  %v1511_v19 = vadd.f32 %v2384_v22, %v1510_v16 }
 0x3b3   : > { %v1403_v20 = vpack.c.bf16 %v1386_v18, %v1385_v17  ;;  %v1574_v49 = vmax.f32 %v1511_v19, 0.0 }
 0x3b5   : > { %1606 = vst [vmem:[%s2391_s15 + $0x58] sm:$0xff] %v1574_v49  ;;  %1914 = vmatmul.msk.bf16.gmra.mxu2 %vm1425_vm2, %v1403_v20 }
 0x3b6   : > { %v1352_v14 = vpop.f32.mrf.mxu3 }
 0x3b7   : > { %v1353_v27 = vadd.f32 %v2337_v56, %v1352_v14 }
 0x3b8   : > { %v1513_v21 = vpop.f32.mrf.mxu2 }
 0x3b9   : > { %v1514_v23 = vadd.f32 %v2384_v22, %v1513_v21  ;;  %v1387_v32 = vmax.f32 %v1353_v27, 0.0 }
 0x3bb   : > { %v1575_v26 = vmax.f32 %v1514_v23, 0.0 }
 0x3bd   : > { %1607 = vst [vmem:[%s2391_s15 + $0x60] sm:$0xff] %v1575_v26 }
 0x3be   : > { %v1354_v28 = vpop.f32.mrf.mxu3 }
 0x3bf   : > { %v1355_v29 = vadd.f32 %v2337_v56, %v1354_v28 }
 0x3c0   : > { %v1515_v31 = vpop.f32.mrf.mxu2 }
 0x3c1   : > { %v1388_v33 = vmax.f32 %v1355_v29, 0.0  ;;  %v1516_v34 = vadd.f32 %v2384_v22, %v1515_v31 }
 0x3c3   : > { %v1404_v35 = vpack.c.bf16 %v1388_v33, %v1387_v32  ;;  %v1576_v57 = vmax.f32 %v1516_v34, 0.0 }
 0x3c5   : > { %1608 = vst [vmem:[%s2391_s15 + $0x68] sm:$0xff] %v1576_v57  ;;  %1915 = vmatmul.msk.bf16.gmra.mxu2 %vm1425_vm2, %v1404_v35 }
 0x3c8   : > { %v1518_v36 = vpop.f32.mrf.mxu2 }
 0x3c9   : > { %v1519_v37 = vadd.f32 %v2384_v22, %v1518_v36 }
 0x3cb   : > { %v1577_v38 = vmax.f32 %v1519_v37, 0.0 }
 0x3cd   : > { %1609 = vst [vmem:[%s2391_s15 + $0x70] sm:$0xff] %v1577_v38 }
 0x3d0   : > { %v1520_v56 = vpop.f32.mrf.mxu2 }
 0x3d1   : > { %v1521_v40 = vadd.f32 %v2384_v22, %v1520_v56 }
 0x3d3   : > { %v1578_v42 = vmax.f32 %v1521_v40, 0.0 }
 0x3d5   : > { %1610 = vst [vmem:[%s2391_s15 + $0x78] sm:$0xff] %v1578_v42 }
 0x3d8   : > { %v1523_v43 = vpop.f32.mrf.mxu2 }
 0x3d9   : > { %v1524_v10 = vadd.f32 %v2384_v22, %v1523_v43 }
 0x3db   : > { %v1579_v58 = vmax.f32 %v1524_v10, 0.0 }
 0x3dd   : > { %1611 = vst [vmem:[%s2391_s15 + $0x80] sm:$0xff] %v1579_v58 }
 0x3e0   : > { %v1525_v44 = vpop.f32.mrf.mxu2 }
 0x3e1   : > { %v1526_v45 = vadd.f32 %v2384_v22, %v1525_v44 }
 0x3e3   : > { %v1580_v46 = vmax.f32 %v1526_v45, 0.0 }
 0x3e5   : > { %1612 = vst [vmem:[%s2391_s15 + $0x88] sm:$0xff] %v1580_v46 }
 0x3e8   : > { %v1528_v47 = vpop.f32.mrf.mxu2 }
 0x3e9   : > { %v1529_v48 = vadd.f32 %v2384_v22, %v1528_v47 }
 0x3eb   : > { %v1581_v39 = vmax.f32 %v1529_v48, 0.0 }
 0x3ed   : > { %1613 = vst [vmem:[%s2391_s15 + $0x90] sm:$0xff] %v1581_v39 }
 0x3f0   : > { %v1530_v25 = vpop.f32.mrf.mxu2 }
 0x3f1   : > { %v1531_v9 = vadd.f32 %v2384_v22, %v1530_v25 }
 0x3f3   : > { %v1582_v50 = vmax.f32 %v1531_v9, 0.0 }
 0x3f5   : > { %1614 = vst [vmem:[%s2391_s15 + $0x98] sm:$0xff] %v1582_v50 }
 0x3f8   : > { %v1533_v51 = vpop.f32.mrf.mxu2 }
 0x3f9   : > { %v1534_v52 = vadd.f32 %v2384_v22, %v1533_v51 }
 0x3fb   : > { %v1583_v54 = vmax.f32 %v1534_v52, 0.0 }
 0x3fd   : > { %1615 = vst [vmem:[%s2391_s15 + $0xa0] sm:$0xff] %v1583_v54 }
 0x400   : > { %v1535_v55 = vpop.f32.mrf.mxu2 }
 0x401   : > { %v1536_v41 = vadd.f32 %v2384_v22, %v1535_v55 }
 0x403   : > { %v1584_v24 = vmax.f32 %v1536_v41, 0.0 }
 0x405   : > { %1616 = vst [vmem:[%s2391_s15 + $0xa8] sm:$0xff] %v1584_v24 }
 0x408   : > { %v1538_v59 = vpop.f32.mrf.mxu2 }
 0x409   : > { %v1539_v60 = vadd.f32 %v2384_v22, %v1538_v59 }
 0x40b   : > { %v1585_v61 = vmax.f32 %v1539_v60, 0.0 }
 0x40d   : > { %1617 = vst [vmem:[%s2391_s15 + $0xb0] sm:$0xff] %v1585_v61 }
 0x410   : > { %v1540_v62 = vpop.f32.mrf.mxu2 }
 0x411   : > { %v1541_v63 = vadd.f32 %v2384_v22, %v1540_v62 }
 0x413   : > { %v1586_v0 = vmax.f32 %v1541_v63, 0.0 }
 0x415   : > { %1618 = vst [vmem:[%s2391_s15 + $0xb8] sm:$0xff] %v1586_v0 }
 0x418   : > { %v1543_v53 = vpop.f32.mrf.mxu2 }
 0x419   : > { %v1544_v1 = vadd.f32 %v2384_v22, %v1543_v53 }
 0x41b   : > { %v1587_v2 = vmax.f32 %v1544_v1, 0.0 }
 0x41d   : > { %1619 = vst [vmem:[%s2391_s15 + $0xc0] sm:$0xff] %v1587_v2 }
 0x420   : > { %v1545_v30 = vpop.f32.mrf.mxu2 }
 0x421   : > { %v1546_v3 = vadd.f32 %v2384_v22, %v1545_v30 }
 0x423   : > { %v1588_v4 = vmax.f32 %v1546_v3, 0.0 }
 0x425   : > { %1620 = vst [vmem:[%s2391_s15 + $0xc8] sm:$0xff] %v1588_v4 }
 0x428   : > { %v1548_v5 = vpop.f32.mrf.mxu2 }
 0x429   : > { %v1549_v6 = vadd.f32 %v2384_v22, %v1548_v5 }
 0x42b   : > { %v1589_v7 = vmax.f32 %v1549_v6, 0.0 }
 0x42d   : > { %1621 = vst [vmem:[%s2391_s15 + $0xd0] sm:$0xff] %v1589_v7 }
 0x430   : > { %v1550_v8 = vpop.f32.mrf.mxu2 }
 0x431   : > { %v1551_v11 = vadd.f32 %v2384_v22, %v1550_v8 }
 0x433   : > { %v1590_v12 = vmax.f32 %v1551_v11, 0.0 }
 0x435   : > { %1622 = vst [vmem:[%s2391_s15 + $0xd8] sm:$0xff] %v1590_v12 }
 0x438   : > { %v1553_v13 = vpop.f32.mrf.mxu2 }
 0x439   : > { %v1554_v15 = vadd.f32 %v2384_v22, %v1553_v13 }
 0x43b   : > { %v1591_v16 = vmax.f32 %v1554_v15, 0.0 }
 0x43d   : > { %1623 = vst [vmem:[%s2391_s15 + $0xe0] sm:$0xff] %v1591_v16 }
 0x440   : > { %v1555_v17 = vpop.f32.mrf.mxu2 }
 0x441   : > { %v1556_v18 = vadd.f32 %v2384_v22, %v1555_v17 }
 0x443   : > { %v1592_v19 = vmax.f32 %v1556_v18, 0.0 }
 0x445   : > { %1624 = vst [vmem:[%s2391_s15 + $0xe8] sm:$0xff] %v1592_v19 }
 0x448   : > { %v1558_v20 = vpop.f32.mrf.mxu2 }
 0x449   : > { %v1559_v49 = vadd.f32 %v2384_v22, %v1558_v20 }
 0x44b   : > { %v1593_v14 = vmax.f32 %v1559_v49, 0.0 }
 0x44d   : > { %1625 = vst [vmem:[%s2391_s15 + $0xf0] sm:$0xff] %v1593_v14 }
 0x450   : > { %v1560_v21 = vpop.f32.mrf.mxu2 }
 0x451   : > { %v1561_v23 = vadd.f32 %v2384_v22, %v1560_v21 }
 0x453   : > { %v1594_v26 = vmax.f32 %v1561_v23, 0.0 }
 0x455   : > { %1626 = vst [vmem:[%s2391_s15 + $0xf8] sm:$0xff] %v1594_v26 }
 0x456 PF: > { %s21_s17 = sadd.s32 1, %s1991_s17  }
 0x457   : > { %p18_p4 = scmp.ge.s32.totalorder %s21_s17, 10  }
 0x459   :  { %20 = sbr.rel (!%p18_p4) target bundleno = 1 (0x1), region = 94 }

</bundles_post_ra>
